<compile_context>
chip_gen: v5e
topology: v5e:2x2
jax: 0.10.0
libtpu: 0.0.40
codegen_flags: <defaults>
</compile_context>

<pallas_src>
import jax
import jax.numpy as jnp
from jax.experimental import pallas as pl
from jax.experimental.pallas import tpu as pltpu

CONTACT_SIZE = 3
GRIPPER_IDX_SIZE = 1
BN_EPS = 1e-5
HEAD_W = 128                       # lane-dense head / output slab width
MAX_BATCH_TILE = 512               # batch rows per grid step (sublane-aligned)

# f32 everywhere by default (exact vs. reference). On v6e/v7x you may set this
# to jnp.bfloat16: matmul operands go bf16 (native MXU), accumulation and all
# elementwise/EUP math stays f32.
MATMUL_DTYPE = jnp.float32


def _round_up(x, m):
    return (x + m - 1) // m * m


# ----------------------------------------------------------------------------
# Pallas kernel: 4 folded Linear+BN+ReLU blocks + fused two-head output.
# One batch tile per grid step; weights resident across the whole grid.
# ----------------------------------------------------------------------------
def _mlp_kernel(cfg_ref, con_ref, grip_ref,
                w1a_ref, w1b_ref, w1c_ref,
                w2_ref, w3_ref, w4_ref,
                wh_ref, wg2_ref, sh_ref,
                out_ref):
    f32 = jnp.float32
    h1 = w1a_ref.shape[1]
    h2 = w2_ref.shape[1]
    h3 = w3_ref.shape[1]
    h4 = w4_ref.shape[1]
    head_w = wh_ref.shape[1]

    cfg = cfg_ref[...].astype(MATMUL_DTYPE)
    con = con_ref[...].astype(MATMUL_DTYPE)
    grip = grip_ref[...]                          # (TB, 1), stays f32 (VPU path)

    # ---- block1: concat replaced by partial dots + rank-1 VPU update -------
    y = jnp.dot(cfg, w1a_ref[...], preferred_element_type=f32)
    y = y + jnp.dot(con, w1b_ref[...], preferred_element_type=f32)
    y = y + grip * w1c_ref[...].astype(f32)       # (TB,1)*(1,h1) outer product
    h = jnp.maximum(y + sh_ref[0:1, 0:h1], 0.0)   # folded BN shift + ReLU

    # ---- blocks 2..4: relu(h @ W' + t') -------------------------------------
    h = jnp.maximum(
        jnp.dot(h.astype(MATMUL_DTYPE), w2_ref[...], preferred_element_type=f32)
        + sh_ref[1:2, 0:h2], 0.0)
    h = jnp.maximum(
        jnp.dot(h.astype(MATMUL_DTYPE), w3_ref[...], preferred_element_type=f32)
        + sh_ref[2:3, 0:h3], 0.0)
    h = jnp.maximum(
        jnp.dot(h.astype(MATMUL_DTYPE), w4_ref[...], preferred_element_type=f32)
        + sh_ref[3:4, 0:h4], 0.0)

    # ---- fused heads: one (h4, 128) matmul ----------------------------------
    # lanes 0:3          -> contact logits (plain Linear, no ReLU)
    # lanes 3:3+h5       -> gripper hidden pre-activation (folded Linear+BN)
    # remaining lanes    -> exactly zero
    head = (jnp.dot(h.astype(MATMUL_DTYPE), wh_ref[...], preferred_element_type=f32)
            + sh_ref[4:5, 0:head_w])

    # gripper: ReLU -> Linear(lane-replicated weight) -> sigmoid.
    # wg2_ref rows 0:3 and 3+h5: are zero, so contact lanes / padding do not
    # contribute; every output lane carries the same (true) logit.
    g = jnp.maximum(head, 0.0)
    logit = (jnp.dot(g.astype(MATMUL_DTYPE), wg2_ref[...], preferred_element_type=f32)
             + sh_ref[5:6, 0:head_w])
    gripper = jax.nn.sigmoid(logit)               # (TB, 128), value in every lane

    # Single unmasked lane-dense store: contact in lanes 0:3, gripper elsewhere.
    lane = jax.lax.broadcasted_iota(jnp.int32, head.shape, 1)
    out_ref[...] = jnp.where(lane < CONTACT_SIZE, head, gripper)


@jax.jit
def next_keypoint_predictor(config_emb, cur_contact, cur_gripper, packed_params):
    """Forward pass. Inputs: (B, config_emb_size), (B, 3), (B, 1)."""
    B, C = config_emb.shape
    (w1a, w1b, w1c, w2f, w3f, w4f, w_head, wg2_full, shifts) = packed_params

    # Pad batch to a sublane multiple and pick a batch tile.
    tb = min(_round_up(B, 8), MAX_BATCH_TILE)
    b_pad = _round_up(B, tb)
    n_tiles = b_pad // tb

    def pad_rows(x):
        if b_pad == B:
            return x.astype(jnp.float32)
        return jnp.pad(x.astype(jnp.float32), ((0, b_pad - B), (0, 0)))

    cfg = pad_rows(config_emb)
    con = pad_rows(cur_contact)
    grip = pad_rows(cur_gripper)

    def full(arr):
        # Whole-array block, resident across all grid steps (single DMA).
        return pl.BlockSpec(arr.shape, lambda i: (0,) * arr.ndim)

    batch_spec = lambda w: pl.BlockSpec((tb, w), lambda i: (i, 0))

    out = pl.pallas_call(
        _mlp_kernel,
        out_shape=jax.ShapeDtypeStruct((b_pad, HEAD_W), jnp.float32),
        grid=(n_tiles,),
        in_specs=[
            batch_spec(C),                    # config_emb tile
            batch_spec(CONTACT_SIZE),         # cur_contact tile
            batch_spec(GRIPPER_IDX_SIZE),     # cur_gripper tile
            full(w1a), full(w1b), full(w1c),
            full(w2f), full(w3f), full(w4f),
            full(w_head), full(wg2_full), full(shifts),
        ],
        out_specs=pl.BlockSpec((tb, HEAD_W), lambda i: (i, 0)),
        compiler_params=pltpu.CompilerParams(
            dimension_semantics=("parallel",)),
    )(cfg, con, grip, w1a, w1b, w1c, w2f, w3f, w4f, w_head, wg2_full, shifts)

    # cheap wrapper-side slices of the lane-dense slab
    return (out[:B, :CONTACT_SIZE],
            out[:B, CONTACT_SIZE:CONTACT_SIZE + GRIPPER_IDX_SIZE])


# ----------------------------------------------------------------------------
# Deterministic "raw" (torch-layout) parameter construction.
# ----------------------------------------------------------------------------
def _make_linear(key, in_f, out_f, scale=0.1):
    kw, kb = jax.random.split(key)
    w = jax.random.normal(kw, (in_f, out_f), jnp.float32) * scale   # (in, out)
    b = jax.random.normal(kb, (1, out_f), jnp.float32) * scale
    return w, b


def _make_bn(key, dim):
    kg, kb, km, kv = jax.random.split(key, 4)
    gamma = 1.0 + 0.05 * jax.random.normal(kg, (1, dim), jnp.float32)
    beta = 0.05 * jax.random.normal(kb, (1, dim), jnp.float32)
    running_mean = 0.05 * jax.random.normal(km, (1, dim), jnp.float32)
    running_var = 1.0 + 0.05 * jax.random.uniform(kv, (1, dim), jnp.float32)
    scale = gamma / jnp.sqrt(running_var + BN_EPS)
    shift = beta - running_mean * scale
    return scale, shift


def build_raw_params(config_emb_size, hidden_size, seed=1):
    input_size = config_emb_size + CONTACT_SIZE + GRIPPER_IDX_SIZE
    h1, h2, h3, h4, h5 = (hidden_size, hidden_size // 2, hidden_size // 4,
                          hidden_size // 8, hidden_size // 16)
    keys = jax.random.split(jax.random.PRNGKey(seed), 12)

    w1, b1 = _make_linear(keys[0], input_size, h1); s1, t1 = _make_bn(keys[1], h1)
    w2, b2 = _make_linear(keys[2], h1, h2);        s2, t2 = _make_bn(keys[3], h2)
    w3, b3 = _make_linear(keys[4], h2, h3);        s3, t3 = _make_bn(keys[5], h3)
    w4, b4 = _make_linear(keys[6], h3, h4);        s4, t4 = _make_bn(keys[7], h4)
    wc, bc = _make_linear(keys[8], h4, CONTACT_SIZE)
    wg1, bg1 = _make_linear(keys[9], h4, h5);      sg, tg = _make_bn(keys[10], h5)
    wg2, bg2 = _make_linear(keys[11], h5, GRIPPER_IDX_SIZE)

    return (w1, b1, s1, t1, w2, b2, s2, t2, w3, b3, s3, t3,
            w4, b4, s4, t4, wc, bc, wg1, bg1, sg, tg, wg2, bg2)


# ----------------------------------------------------------------------------
# Host-side folding / packing into the kernel's parameter layout.
# ----------------------------------------------------------------------------
def pack_params(raw, config_emb_size, hidden_size):
    (w1, b1, s1, t1, w2, b2, s2, t2, w3, b3, s3, t3,
     w4, b4, s4, t4, wc, bc, wg1, bg1, sg, tg, wg2, bg2) = raw
    C = config_emb_size
    h1, h2, h3, h4, h5 = (hidden_size, hidden_size // 2, hidden_size // 4,
                          hidden_size // 8, hidden_size // 16)
    assert CONTACT_SIZE + h5 <= HEAD_W, "gripper hidden width exceeds head slab"

    # Fold Linear bias + eval BN into (W', t') per block.
    w1f = w1 * s1                      # scale output columns
    t1f = b1 * s1 + t1
    w2f, t2f = w2 * s2, b2 * s2 + t2
    w3f, t3f = w3 * s3, b3 * s3 + t3
    w4f, t4f = w4 * s4, b4 * s4 + t4

    # Split W1' rows so the kernel needs no input concat.
    w1a = w1f[:C]                      # (C, h1)      config embedding part
    w1b = w1f[C:C + CONTACT_SIZE]      # (3, h1)      current contact part
    w1c = w1f[C + CONTACT_SIZE:]       # (1, h1)      current gripper part

    # Fused head weight: contact Linear (no BN) + folded gripper Linear+BN.
    w_head = jnp.zeros((h4, HEAD_W), jnp.float32)
    w_head = w_head.at[:, 0:CONTACT_SIZE].set(wc)
    w_head = w_head.at[:, CONTACT_SIZE:CONTACT_SIZE + h5].set(wg1 * sg)
    t_head = jnp.zeros((1, HEAD_W), jnp.float32)
    t_head = t_head.at[:, 0:CONTACT_SIZE].set(bc)
    t_head = t_head.at[:, CONTACT_SIZE:CONTACT_SIZE + h5].set(bg1 * sg + tg)

    # Final gripper Linear, lane-replicated so the logit lands in every lane.
    wg2_full = jnp.zeros((HEAD_W, HEAD_W), jnp.float32)
    wg2_full = wg2_full.at[CONTACT_SIZE:CONTACT_SIZE + h5, :].set(
        jnp.broadcast_to(wg2, (h5, HEAD_W)))
    bg2_row = jnp.broadcast_to(bg2, (1, HEAD_W))

    # Pack all shift vectors into one (8, SW) buffer -> a single DMA.
    SW = max(h1, HEAD_W)
    shifts = jnp.zeros((8, SW), jnp.float32)
    shifts = shifts.at[0, 0:h1].set(t1f[0])
    shifts = shifts.at[1, 0:h2].set(t2f[0])
    shifts = shifts.at[2, 0:h3].set(t3f[0])
    shifts = shifts.at[3, 0:h4].set(t4f[0])
    shifts = shifts.at[4, 0:HEAD_W].set(t_head[0])
    shifts = shifts.at[5, 0:HEAD_W].set(bg2_row[0])

    md = MATMUL_DTYPE
    return (w1a.astype(md), w1b.astype(md), w1c.astype(jnp.float32),
            w2f.astype(md), w3f.astype(md), w4f.astype(md),
            w_head.astype(md), wg2_full.astype(md), shifts)


# ----------------------------------------------------------------------------
# Pure-JAX reference (unfused, unfolded) for a correctness check.
# ----------------------------------------------------------------------------
def _reference(config_emb, cur_contact, cur_gripper, raw):
    (w1, b1, s1, t1, w2, b2, s2, t2, w3, b3, s3, t3,
     w4, b4, s4, t4, wc, bc, wg1, bg1, sg, tg, wg2, bg2) = raw
    x = jnp.concatenate((config_emb, cur_contact, cur_gripper), axis=1)

    def blk(h, w, b, s, t):
        return jnp.maximum((h @ w + b) * s + t, 0.0)

    h = blk(x, w1, b1, s1, t1)
    h = blk(h, w2, b2, s2, t2)
    h = blk(h, w3, b3, s3, t3)
    h = blk(h, w4, b4, s4, t4)
    contact = h @ wc + bc
    g = blk(h, wg1, bg1, sg, tg)
    gripper = jax.nn.sigmoid(g @ wg2 + bg2)
    return contact, gripper


if __name__ == "__main__":
    # Small shapes consistent with the module's forward:
    #   config_emb: (B, config_emb_size), cur_contact: (B, 3), cur_gripper: (B, 1)
    B = 8
    CONFIG_EMB_SIZE = 28          # -> input_size = 28 + 3 + 1 = 32
    HIDDEN_SIZE = 64              # -> 64, 32, 16, 8; gripper hidden 4

    key = jax.random.PRNGKey(0)
    k_cfg, k_con, k_grip = jax.random.split(key, 3)
    config_emb = jax.random.normal(k_cfg, (B, CONFIG_EMB_SIZE), jnp.float32)
    cur_contact = jax.random.normal(k_con, (B, CONTACT_SIZE), jnp.float32)
    cur_gripper = jax.random.uniform(k_grip, (B, GRIPPER_IDX_SIZE), jnp.float32)

    raw_params = build_raw_params(CONFIG_EMB_SIZE, HIDDEN_SIZE, seed=1)
    packed_params = pack_params(raw_params, CONFIG_EMB_SIZE, HIDDEN_SIZE)

    contact_pred, gripper_pred = next_keypoint_predictor(
        config_emb, cur_contact, cur_gripper, packed_params)
    jax.block_until_ready((contact_pred, gripper_pred))

    # correctness check vs pure-JAX reference (folding changes rounding order)
    ref_contact, ref_gripper = _reference(config_emb, cur_contact, cur_gripper,
                                          raw_params)
    assert contact_pred.shape == (B, CONTACT_SIZE)
    assert gripper_pred.shape == (B, GRIPPER_IDX_SIZE)
    assert jnp.allclose(contact_pred, ref_contact, atol=1e-4, rtol=1e-4)
    assert jnp.allclose(gripper_pred, ref_gripper, atol=1e-4, rtol=1e-4)

    print("KERNEL_OK")
</pallas_src>

<mosaic_0001>
module attributes {stable_mosaic.version = 11 : i64} {
  func.func @_mlp_kernel(%arg0: i32, %arg1: memref<8x28xf32, #tpu.memory_space<vmem>>, %arg2: memref<8x3xf32, #tpu.memory_space<vmem>>, %arg3: memref<8x1xf32, #tpu.memory_space<vmem>>, %arg4: memref<28x64xf32, #tpu.memory_space<vmem>>, %arg5: memref<3x64xf32, #tpu.memory_space<vmem>>, %arg6: memref<1x64xf32, #tpu.memory_space<vmem>>, %arg7: memref<64x32xf32, #tpu.memory_space<vmem>>, %arg8: memref<32x16xf32, #tpu.memory_space<vmem>>, %arg9: memref<16x8xf32, #tpu.memory_space<vmem>>, %arg10: memref<8x128xf32, #tpu.memory_space<vmem>>, %arg11: memref<128x128xf32, #tpu.memory_space<vmem>>, %arg12: memref<8x128xf32, #tpu.memory_space<vmem>>, %arg13: memref<8x128xf32, #tpu.memory_space<vmem>>) attributes {dimension_semantics = [#tpu.dimension_semantics<parallel>], iteration_bounds = array<i64: 1>, scalar_prefetch = 0 : i64, scratch_operands = 0 : i64, tpu.core_type = #tpu.core_type<tc>, window_params = [{transform_indices = @transform_0, window_bounds = array<i64: 8, 28>}, {transform_indices = @transform_1, window_bounds = array<i64: 8, 3>}, {transform_indices = @transform_2, window_bounds = array<i64: 8, 1>}, {pipeline_mode = #tpu.pipeline_mode<synchronous>, transform_indices = @transform_3, window_bounds = array<i64: 28, 64>}, {pipeline_mode = #tpu.pipeline_mode<synchronous>, transform_indices = @transform_4, window_bounds = array<i64: 3, 64>}, {pipeline_mode = #tpu.pipeline_mode<synchronous>, transform_indices = @transform_5, window_bounds = array<i64: 1, 64>}, {pipeline_mode = #tpu.pipeline_mode<synchronous>, transform_indices = @transform_6, window_bounds = array<i64: 64, 32>}, {pipeline_mode = #tpu.pipeline_mode<synchronous>, transform_indices = @transform_7, window_bounds = array<i64: 32, 16>}, {pipeline_mode = #tpu.pipeline_mode<synchronous>, transform_indices = @transform_8, window_bounds = array<i64: 16, 8>}, {pipeline_mode = #tpu.pipeline_mode<synchronous>, transform_indices = @transform_9, window_bounds = array<i64: 8, 128>}, {pipeline_mode = #tpu.pipeline_mode<synchronous>, transform_indices = @transform_10, window_bounds = array<i64: 128, 128>}, {pipeline_mode = #tpu.pipeline_mode<synchronous>, transform_indices = @transform_11, window_bounds = array<i64: 8, 128>}, {transform_indices = @transform_12, window_bounds = array<i64: 8, 128>}]} {
    %c0 = arith.constant 0 : index
    %c0_0 = arith.constant 0 : index
    %0 = vector.load %arg1[%c0, %c0_0] : memref<8x28xf32, #tpu.memory_space<vmem>>, vector<8x28xf32>
    %c0_1 = arith.constant 0 : index
    %c0_2 = arith.constant 0 : index
    %1 = vector.load %arg2[%c0_1, %c0_2] : memref<8x3xf32, #tpu.memory_space<vmem>>, vector<8x3xf32>
    %c0_3 = arith.constant 0 : index
    %c0_4 = arith.constant 0 : index
    %2 = vector.load %arg3[%c0_3, %c0_4] : memref<8x1xf32, #tpu.memory_space<vmem>>, vector<8x1xf32>
    %c0_5 = arith.constant 0 : index
    %c0_6 = arith.constant 0 : index
    %3 = vector.load %arg4[%c0_5, %c0_6] : memref<28x64xf32, #tpu.memory_space<vmem>>, vector<28x64xf32>
    %cst = arith.constant dense<0.000000e+00> : vector<8x64xf32>
    %4 = tpu.matmul %0, %3, %cst {dimension_numbers = #tpu.dot_dimension_numbers<[1], [0], [0], [1], [0, 0, 1, 1], [], []>} : vector<8x28xf32>, vector<28x64xf32>, vector<8x64xf32> -> vector<8x64xf32>
    %c0_7 = arith.constant 0 : index
    %c0_8 = arith.constant 0 : index
    %5 = vector.load %arg5[%c0_7, %c0_8] : memref<3x64xf32, #tpu.memory_space<vmem>>, vector<3x64xf32>
    %cst_9 = arith.constant dense<0.000000e+00> : vector<8x64xf32>
    %6 = tpu.matmul %1, %5, %cst_9 {dimension_numbers = #tpu.dot_dimension_numbers<[1], [0], [0], [1], [0, 0, 1, 1], [], []>} : vector<8x3xf32>, vector<3x64xf32>, vector<8x64xf32> -> vector<8x64xf32>
    %7 = arith.addf %4, %6 : vector<8x64xf32>
    %c0_10 = arith.constant 0 : index
    %c0_11 = arith.constant 0 : index
    %8 = vector.load %arg6[%c0_10, %c0_11] : memref<1x64xf32, #tpu.memory_space<vmem>>, vector<1x64xf32>
    %9 = vector.broadcast %2 : vector<8x1xf32> to vector<8x64xf32>
    %10 = vector.broadcast %8 : vector<1x64xf32> to vector<8x64xf32>
    %11 = arith.mulf %9, %10 : vector<8x64xf32>
    %12 = arith.addf %7, %11 : vector<8x64xf32>
    %c0_12 = arith.constant 0 : index
    %c0_13 = arith.constant 0 : index
    %13 = vector.load %arg12[%c0_12, %c0_13] : memref<8x128xf32, #tpu.memory_space<vmem>>, vector<1x64xf32>
    %14 = vector.broadcast %13 : vector<1x64xf32> to vector<8x64xf32>
    %15 = arith.addf %12, %14 : vector<8x64xf32>
    %cst_14 = arith.constant 0.000000e+00 : f32
    %16 = vector.broadcast %cst_14 : f32 to vector<8x64xf32>
    %17 = arith.maximumf %15, %16 : vector<8x64xf32>
    %c0_15 = arith.constant 0 : index
    %c0_16 = arith.constant 0 : index
    %18 = vector.load %arg7[%c0_15, %c0_16] : memref<64x32xf32, #tpu.memory_space<vmem>>, vector<64x32xf32>
    %cst_17 = arith.constant dense<0.000000e+00> : vector<8x32xf32>
    %19 = tpu.matmul %17, %18, %cst_17 {dimension_numbers = #tpu.dot_dimension_numbers<[1], [0], [0], [1], [0, 0, 1, 1], [], []>} : vector<8x64xf32>, vector<64x32xf32>, vector<8x32xf32> -> vector<8x32xf32>
    %c1 = arith.constant 1 : index
    %c0_18 = arith.constant 0 : index
    %20 = vector.load %arg12[%c1, %c0_18] : memref<8x128xf32, #tpu.memory_space<vmem>>, vector<1x32xf32>
    %21 = vector.broadcast %20 : vector<1x32xf32> to vector<8x32xf32>
    %22 = arith.addf %19, %21 : vector<8x32xf32>
    %cst_19 = arith.constant 0.000000e+00 : f32
    %23 = vector.broadcast %cst_19 : f32 to vector<8x32xf32>
    %24 = arith.maximumf %22, %23 : vector<8x32xf32>
    %c0_20 = arith.constant 0 : index
    %c0_21 = arith.constant 0 : index
    %25 = vector.load %arg8[%c0_20, %c0_21] : memref<32x16xf32, #tpu.memory_space<vmem>>, vector<32x16xf32>
    %cst_22 = arith.constant dense<0.000000e+00> : vector<8x16xf32>
    %26 = tpu.matmul %24, %25, %cst_22 {dimension_numbers = #tpu.dot_dimension_numbers<[1], [0], [0], [1], [0, 0, 1, 1], [], []>} : vector<8x32xf32>, vector<32x16xf32>, vector<8x16xf32> -> vector<8x16xf32>
    %c2 = arith.constant 2 : index
    %c0_23 = arith.constant 0 : index
    %27 = vector.load %arg12[%c2, %c0_23] : memref<8x128xf32, #tpu.memory_space<vmem>>, vector<1x16xf32>
    %28 = vector.broadcast %27 : vector<1x16xf32> to vector<8x16xf32>
    %29 = arith.addf %26, %28 : vector<8x16xf32>
    %cst_24 = arith.constant 0.000000e+00 : f32
    %30 = vector.broadcast %cst_24 : f32 to vector<8x16xf32>
    %31 = arith.maximumf %29, %30 : vector<8x16xf32>
    %c0_25 = arith.constant 0 : index
    %c0_26 = arith.constant 0 : index
    %32 = vector.load %arg9[%c0_25, %c0_26] : memref<16x8xf32, #tpu.memory_space<vmem>>, vector<16x8xf32>
    %cst_27 = arith.constant dense<0.000000e+00> : vector<8x8xf32>
    %33 = tpu.matmul %31, %32, %cst_27 {dimension_numbers = #tpu.dot_dimension_numbers<[1], [0], [0], [1], [0, 0, 1, 1], [], []>} : vector<8x16xf32>, vector<16x8xf32>, vector<8x8xf32> -> vector<8x8xf32>
    %c3 = arith.constant 3 : index
    %c0_28 = arith.constant 0 : index
    %34 = vector.load %arg12[%c3, %c0_28] : memref<8x128xf32, #tpu.memory_space<vmem>>, vector<1x8xf32>
    %35 = vector.broadcast %34 : vector<1x8xf32> to vector<8x8xf32>
    %36 = arith.addf %33, %35 : vector<8x8xf32>
    %cst_29 = arith.constant 0.000000e+00 : f32
    %37 = vector.broadcast %cst_29 : f32 to vector<8x8xf32>
    %38 = arith.maximumf %36, %37 : vector<8x8xf32>
    %c0_30 = arith.constant 0 : index
    %c0_31 = arith.constant 0 : index
    %39 = vector.load %arg10[%c0_30, %c0_31] : memref<8x128xf32, #tpu.memory_space<vmem>>, vector<8x128xf32>
    %cst_32 = arith.constant dense<0.000000e+00> : vector<8x128xf32>
    %40 = tpu.matmul %38, %39, %cst_32 {dimension_numbers = #tpu.dot_dimension_numbers<[1], [0], [0], [1], [0, 0, 1, 1], [], []>} : vector<8x8xf32>, vector<8x128xf32>, vector<8x128xf32> -> vector<8x128xf32>
    %c4 = arith.constant 4 : index
    %c0_33 = arith.constant 0 : index
    %41 = vector.load %arg12[%c4, %c0_33] : memref<8x128xf32, #tpu.memory_space<vmem>>, vector<1x128xf32>
    %42 = vector.broadcast %41 : vector<1x128xf32> to vector<8x128xf32>
    %43 = arith.addf %40, %42 : vector<8x128xf32>
    %cst_34 = arith.constant 0.000000e+00 : f32
    %44 = vector.broadcast %cst_34 : f32 to vector<8x128xf32>
    %45 = arith.maximumf %43, %44 : vector<8x128xf32>
    %c0_35 = arith.constant 0 : index
    %c0_36 = arith.constant 0 : index
    %46 = vector.load %arg11[%c0_35, %c0_36] : memref<128x128xf32, #tpu.memory_space<vmem>>, vector<128x128xf32>
    %cst_37 = arith.constant dense<0.000000e+00> : vector<8x128xf32>
    %47 = tpu.matmul %45, %46, %cst_37 {dimension_numbers = #tpu.dot_dimension_numbers<[1], [0], [0], [1], [0, 0, 1, 1], [], []>} : vector<8x128xf32>, vector<128x128xf32>, vector<8x128xf32> -> vector<8x128xf32>
    %c5 = arith.constant 5 : index
    %c0_38 = arith.constant 0 : index
    %48 = vector.load %arg12[%c5, %c0_38] : memref<8x128xf32, #tpu.memory_space<vmem>>, vector<1x128xf32>
    %49 = vector.broadcast %48 : vector<1x128xf32> to vector<8x128xf32>
    %50 = arith.addf %47, %49 : vector<8x128xf32>
    %51 = arith.negf %50 : vector<8x128xf32>
    %52 = math.exp %51 : vector<8x128xf32>
    %cst_39 = arith.constant 1.000000e+00 : f32
    %53 = vector.broadcast %cst_39 : f32 to vector<8x128xf32>
    %54 = arith.addf %53, %52 : vector<8x128xf32>
    %55 = arith.divf %53, %54 : vector<8x128xf32>
    %56 = tpu.iota {dimensions = array<i32: 1>} : vector<8x128xi32>
    %c3_i32 = arith.constant 3 : i32
    %57 = vector.broadcast %c3_i32 : i32 to vector<8x128xi32>
    %58 = arith.cmpi slt, %56, %57 : vector<8x128xi32>
    %59 = arith.select %58, %43, %55 : vector<8x128xi1>, vector<8x128xf32>
    %c0_40 = arith.constant 0 : index
    %c0_41 = arith.constant 0 : index
    %60 = vector.load %arg13[%c0_40, %c0_41] : memref<8x128xf32, #tpu.memory_space<vmem>>, vector<8x128xf32>
    tpu.vector_store %arg13[%c0_40, %c0_41], %59 {strides = array<i32>} : memref<8x128xf32, #tpu.memory_space<vmem>>, vector<8x128xf32>,
    return
  }
  func.func @transform_0(%arg0: i32) -> (i32, i32) {
    %c0_i32 = arith.constant 0 : i32
    %c0_i32_0 = arith.constant 0 : i32
    return %arg0, %c0_i32 : i32, i32
  }
  func.func @transform_1(%arg0: i32) -> (i32, i32) {
    %c0_i32 = arith.constant 0 : i32
    %c0_i32_0 = arith.constant 0 : i32
    return %arg0, %c0_i32 : i32, i32
  }
  func.func @transform_2(%arg0: i32) -> (i32, i32) {
    %c0_i32 = arith.constant 0 : i32
    %c0_i32_0 = arith.constant 0 : i32
    return %arg0, %c0_i32 : i32, i32
  }
  func.func @transform_3(%arg0: i32) -> (i32, i32) {
    %c0_i32 = arith.constant 0 : i32
    %c0_i32_0 = arith.constant 0 : i32
    %c0_i32_1 = arith.constant 0 : i32
    return %c0_i32, %c0_i32_0 : i32, i32
  }
  func.func @transform_4(%arg0: i32) -> (i32, i32) {
    %c0_i32 = arith.constant 0 : i32
    %c0_i32_0 = arith.constant 0 : i32
    %c0_i32_1 = arith.constant 0 : i32
    return %c0_i32, %c0_i32_0 : i32, i32
  }
  func.func @transform_5(%arg0: i32) -> (i32, i32) {
    %c0_i32 = arith.constant 0 : i32
    %c0_i32_0 = arith.constant 0 : i32
    %c0_i32_1 = arith.constant 0 : i32
    return %c0_i32, %c0_i32_0 : i32, i32
  }
  func.func @transform_6(%arg0: i32) -> (i32, i32) {
    %c0_i32 = arith.constant 0 : i32
    %c0_i32_0 = arith.constant 0 : i32
    %c0_i32_1 = arith.constant 0 : i32
    return %c0_i32, %c0_i32_0 : i32, i32
  }
  func.func @transform_7(%arg0: i32) -> (i32, i32) {
    %c0_i32 = arith.constant 0 : i32
    %c0_i32_0 = arith.constant 0 : i32
    %c0_i32_1 = arith.constant 0 : i32
    return %c0_i32, %c0_i32_0 : i32, i32
  }
  func.func @transform_8(%arg0: i32) -> (i32, i32) {
    %c0_i32 = arith.constant 0 : i32
    %c0_i32_0 = arith.constant 0 : i32
    %c0_i32_1 = arith.constant 0 : i32
    return %c0_i32, %c0_i32_0 : i32, i32
  }
  func.func @transform_9(%arg0: i32) -> (i32, i32) {
    %c0_i32 = arith.constant 0 : i32
    %c0_i32_0 = arith.constant 0 : i32
    %c0_i32_1 = arith.constant 0 : i32
    return %c0_i32, %c0_i32_0 : i32, i32
  }
  func.func @transform_10(%arg0: i32) -> (i32, i32) {
    %c0_i32 = arith.constant 0 : i32
    %c0_i32_0 = arith.constant 0 : i32
    %c0_i32_1 = arith.constant 0 : i32
    return %c0_i32, %c0_i32_0 : i32, i32
  }
  func.func @transform_11(%arg0: i32) -> (i32, i32) {
    %c0_i32 = arith.constant 0 : i32
    %c0_i32_0 = arith.constant 0 : i32
    %c0_i32_1 = arith.constant 0 : i32
    return %c0_i32, %c0_i32_0 : i32, i32
  }
  func.func @transform_12(%arg0: i32) -> (i32, i32) {
    %c0_i32 = arith.constant 0 : i32
    %c0_i32_0 = arith.constant 0 : i32
    return %arg0, %c0_i32 : i32, i32
  }
}

</mosaic_0001>

<bundles_post_ra>
// kernel: next_keypoint_predictor.1
= control target key start
LH: loop header
LB: loop body
LE: loop exit
PB: predicated region body
PF: predicated region fallthrough
CT: control target
= control target key end

     0   :  { %17 = vsyncpa [#allocation3], 0  ;;  %s688_s0 = inlined_call_operand.hbm [shape: f32[8,28], index: 0, kind: input, shape index: {}]   ;;  %s689_s1 = inlined_call_operand.vmem [shape: f32[8,3], index: 1, kind: input, shape index: {}]   ;;  %s690_s2 = inlined_call_operand.vmem [shape: f32[8,1], index: 2, kind: input, shape index: {}]   ;;  %s691_s3 = inlined_call_operand.hbm [shape: f32[28,64], index: 3, kind: input, shape index: {}]   ;;  %s692_s4 = inlined_call_operand.hbm [shape: f32[3,64], index: 4, kind: input, shape index: {}]   ;;  %s693_s5 = inlined_call_operand.vmem [shape: f32[1,64], index: 5, kind: input, shape index: {}]   ;;  %s694_s6 = inlined_call_operand.vmem [shape: f32[64,32], index: 6, kind: input, shape index: {}]   ;;  %s695_s7 = inlined_call_operand.vmem [shape: f32[32,16], index: 7, kind: input, shape index: {}]   ;;  %s696_s8 = inlined_call_operand.vmem [shape: f32[16,8], index: 8, kind: input, shape index: {}]   ;;  %s697_s9 = inlined_call_operand.vmem [shape: f32[8,128], index: 9, kind: input, shape index: {}]   ;;  %s698_s10 = inlined_call_operand.vmem [shape: f32[128,128], index: 10, kind: input, shape index: {}]   ;;  %s699_s11 = inlined_call_operand.hbm [shape: f32[8,128], index: 11, kind: input, shape index: {}]   ;;  %s700_s12 = inlined_call_operand.vmem [shape: f32[8,128], index: 12, kind: output, shape index: {}]  }
   0x1   :  { %18 = vsyncpa [#allocation5], 0  ;;  %s39_s23 = sshll.u32 %s691_s3, 4  ;;  %s40_s23 = int_to_ptr.hbm [resolvable:$true] %s39_s23 }
   0x2   :  { %19 = vsyncpa [#allocation8], 0  ;;  %s499_s24 = smov [#allocation4]   ;;  %s25_s28 = sshll.u32 %s688_s0, 4  ;;  %s26_s28 = int_to_ptr.hbm [resolvable:$true] %s25_s28 }
   0x3   :  { %s41_s25 = sshll.u32 %s499_s24, 4  ;;  %s500_s29 = smov 128   ;;  %s42_s25 = int_to_ptr.vmem [resolvable:$true] %s41_s25 }
   0x4   :  { %s501_s30 = smov 8   ;;  %s502_s13 = smov [#allocation2]  }
   0x5   :  { %47 = dma.hbm_to_vmem [thread:$0]  %s40_s23, 512, %s42_s25, [#allocation5], %s500_s29, %s500_s29, %s501_s30  }
   0x6   :  { %s27_s14 = sshll.u32 %s502_s13, 4  ;;  %s53_s17 = sshll.u32 %s692_s4, 4  ;;  %s28_s14 = int_to_ptr.vmem [resolvable:$true] %s27_s14  ;;  %s54_s17 = int_to_ptr.hbm [resolvable:$true] %s53_s17 }
   0x7   :  { %30 = dma.hbm_to_vmem [thread:$0]  %s26_s28, 128, %s28_s14, [#allocation3]  }
   0x8   :  { %s76_s19 = sshll.u32 %s699_s11, 4  ;;  %s503_s20 = smov [#allocation6]   ;;  %s77_s19 = int_to_ptr.hbm [resolvable:$true] %s76_s19 }
   0x9   :  { %s55_s21 = sshll.u32 %s503_s20, 4  ;;  %s504_s0 = smov [#allocation7]   ;;  %s56_s21 = int_to_ptr.vmem [resolvable:$true] %s55_s21 }
   0xa   :  { %58 = dma.hbm_to_vmem [thread:$0]  %s54_s17, 64, %s56_s21, [#allocation5]  }
   0xb   :  { %s78_s22 = sshll.u32 %s504_s0, 4  ;;  %s79_s22 = int_to_ptr.vmem [resolvable:$true] %s78_s22 }
   0xc   :  { %81 = dma.hbm_to_vmem [thread:$0]  %s77_s19, 128, %s79_s22, [#allocation8]  }
   0xd   :  { %493 = dma.done.wait [#allocation3], 128  }
   0xe   :  { %494 = vsyncadd [#allocation3], 4294967168 }
   0xf   :  { %495 = dma.done.wait [#allocation5], 576  }
  0x10   :  { %496 = vsyncadd [#allocation5], 4294966720 }
  0x11   :  { %497 = dma.done.wait [#allocation8], 128  }
  0x12   :  { %498 = vsyncadd [#allocation8], 4294967168  ;;  %v505_v0 = vmov 0   ;;  %vm138_vm0 = vcmask 1043456   ;;  %vm110_vm1 = vcmask 1042432   ;;  %v103_v2 = vld [vmem:[#allocation4 + $0x10] sm:$0xff] }
  0x13   :  { %385 = vset.pattern.permute.xlu0 %v505_v0  ;;  %v104_v1 = vld [vmem:[#allocation4 + $0x18] sm:$0xf]  ;;  %vm106_vm2 = vcmask 23552   ;;  %v105_v3 = vld [vmem:[#allocation6] sm:$0x7]  ;;  %v102_v5 = vld [vmem:[#allocation4 + $0x8] sm:$0xff] }
  0x14   :  { %371 = vmatpush.msk.msra.mxu1 %vm138_vm0, %v104_v1  ;;  %v99_v4 = vld [vmem:[%s689_s1] sm:$0xff]  ;;  %369 = vmatpush.msk.msra.mxu0 %vm110_vm1, %v105_v3  ;;  %v184_v7 = vld [vmem:[%s694_s6 + $0x38] sm:$0xff]  ;;  %v101_v8 = vld [vmem:[#allocation4] sm:$0xff]  ;;  %vm134_vm3 = vcmask 228352   ;;  %vm187_vm4 = vcmask 523264   ;;  %vm218_vm5 = vcmask 261120  }
  0x15   :  { %v100_v6 = vld [vmem:[%s690_s2] sm:$0xff]  ;;  %370 = vmatmul.msk.f32.vlgmr.msra.gmra.mxu0 %vm106_vm2, %v99_v4  ;;  %v183_v10 = vld [vmem:[%s694_s6 + $0x30] sm:$0xff]  ;;  %199 = vmatpush.msra.mxu2 %v184_v7  ;;  %v182_v11 = vld [vmem:[%s694_s6 + $0x28] sm:$0xff]  ;;  %vm247_vm6 = vcmask 130048   ;;  %vm275_vm7 = vcmask 64512  }
  0x16   :  { %155 = vmatpush.msra.mxu1 %v103_v2  ;;  %v98_v9 = vld [vmem:[#allocation2] sm:$0xff]  ;;  %165 = vperm.xlu0 %385, %v100_v6   ;;  %v180_v13 = vld [vmem:[%s694_s6 + $0x18] sm:$0xff]  ;;  %v179_v14 = vld [vmem:[%s694_s6 + $0x10] sm:$0xff] }
  0x17   :  { %200 = vmatpush.msra.mxu2 %v183_v10  ;;  %v181_v12 = vld [vmem:[%s694_s6 + $0x20] sm:$0xff]  ;;  %v178_v15 = vld [vmem:[%s694_s6 + $0x8] sm:$0xff]  ;;  %v215_v17 = vld [vmem:[%s695_s7 + $0x18] sm:$0xff] }
  0x18   :  { %156 = vmatpush.msra.mxu1 %v102_v5  ;;  %v177_v16 = vld [vmem:[%s694_s6] sm:$0xff]  ;;  %v214_v18 = vld [vmem:[%s695_s7 + $0x10] sm:$0xff]  ;;  %234 = vmatpush.msrb.mxu0 %v215_v17  ;;  %v387_v25 = vld [vmem:[#allocation7] ss:$0 sm:$0xff] }
  0x19   :  { %201 = vmatpush.msra.mxu2 %v182_v11  ;;  %v386_v19 = vld [vmem:[%s693_s5] ss:$0 sm:$0xff]  ;;  %v213_v29 = vld [vmem:[%s695_s7 + $0x8] sm:$0xff]  ;;  %v315_v42 = vld [vmem:[%s698_s10 + $0x78] sm:$0xff] }
  0x1a   :  { %157 = vmatpush.msra.mxu1 %v101_v8  ;;  %235 = vmatpush.msrb.mxu0 %v214_v18  ;;  %v212_v30 = vld [vmem:[%s695_s7] sm:$0xff]  ;;  %v244_v31 = vld [vmem:[%s696_s8 + $0x8] sm:$0xff]  ;;  %v314_v43 = vld [vmem:[%s698_s10 + $0x70] sm:$0xff] }
  0x1b   :  { %372 = vmatmul.msk.f32.vlgmr.msra.gmra.mxu1 %vm134_vm3, %v98_v9  ;;  %202 = vmatpush.msra.mxu2 %v181_v12  ;;  %v388_v32 = vld [vmem:[#allocation7 + $0x1] ss:$0 sm:$0xff]  ;;  %v243_v36 = vld [vmem:[%s696_s8] sm:$0xff]  ;;  %v389_v38 = vld [vmem:[#allocation7 + $0x2] ss:$0 sm:$0xff]  ;;  %v357_v9 = vlaneseq }
  0x1c   :  { %236 = vmatpush.msrb.mxu0 %v213_v29  ;;  %v272_v37 = vld [vmem:[%s697_s9] sm:$0xff]  ;;  %318 = vmatpush.msra.mxu3 %v315_v42  ;;  %v313_v44 = vld [vmem:[%s698_s10 + $0x68] sm:$0xff]  ;;  %v311_v46 = vld [vmem:[%s698_s10 + $0x58] sm:$0xff] }
  0x1d   :  { %203 = vmatpush.msra.mxu2 %v180_v13  ;;  %294 = vmatpush.msrb.mxu1 %v272_v37  ;;  %v312_v45 = vld [vmem:[%s698_s10 + $0x60] sm:$0xff]  ;;  %v310_v47 = vld [vmem:[%s698_s10 + $0x50] sm:$0xff]  ;;  %v309_v48 = vld [vmem:[%s698_s10 + $0x48] sm:$0xff]  ;;  %v358_v13 = vand.u32 127, %v357_v9 }
  0x1e   :  { %237 = vmatpush.msrb.mxu0 %v212_v30  ;;  %319 = vmatpush.msra.mxu3 %v314_v43  ;;  %v308_v49 = vld [vmem:[%s698_s10 + $0x40] sm:$0xff]  ;;  %v307_v50 = vld [vmem:[%s698_s10 + $0x38] sm:$0xff]  ;;  %v306_v51 = vld [vmem:[%s698_s10 + $0x30] sm:$0xff] }
  0x1f   :  { %204 = vmatpush.msra.mxu2 %v179_v14  ;;  %v305_v52 = vld [vmem:[%s698_s10 + $0x28] sm:$0xff]  ;;  %v304_v53 = vld [vmem:[%s698_s10 + $0x20] sm:$0xff]  ;;  %v303_v54 = vld [vmem:[%s698_s10 + $0x18] sm:$0xff]  ;;  %vm359_vm11 = vcmp.lt.s32.totalorder %v358_v13, 3 }
  0x20   :  { %265 = vmatpush.msra.mxu0 %v244_v31  ;;  %320 = vmatpush.msra.mxu3 %v313_v44  ;;  %v390_v55 = vld [vmem:[#allocation7 + $0x3] ss:$0 sm:$0xff]  ;;  %v302_v59 = vld [vmem:[%s698_s10 + $0x10] sm:$0xff]  ;;  %v300_v61 = vld [vmem:[%s698_s10] sm:$0xff] }
  0x21   :  { %205 = vmatpush.msra.mxu2 %v178_v15  ;;  %v301_v60 = vld [vmem:[%s698_s10 + $0x8] sm:$0xff]  ;;  %v391_v62 = vld [vmem:[#allocation7 + $0x4] ss:$0 sm:$0xff]  ;;  %v392_v2 = vld [vmem:[#allocation7 + $0x5] ss:$0 sm:$0xff] }
  0x22   :  { %266 = vmatpush.msra.mxu0 %v243_v36  ;;  %321 = vmatpush.msra.mxu3 %v312_v45 }
  0x23   :  { %206 = vmatpush.msra.mxu2 %v177_v16 }
  0x24   :  { %322 = vmatpush.msra.mxu3 %v311_v46 }
  0x26   :  { %323 = vmatpush.msra.mxu3 %v310_v47 }
  0x28   :  { %324 = vmatpush.msra.mxu3 %v309_v48 }
  0x2a   :  { %325 = vmatpush.msra.mxu3 %v308_v49 }
  0x2c   :  { %326 = vmatpush.msra.mxu3 %v307_v50 }
  0x2e   :  { %327 = vmatpush.msra.mxu3 %v306_v51 }
  0x30   :  { %328 = vmatpush.msra.mxu3 %v305_v52 }
  0x32   :  { %329 = vmatpush.msra.mxu3 %v304_v53 }
  0x34   :  { %330 = vmatpush.msra.mxu3 %v303_v54 }
  0x36   :  { %331 = vmatpush.msra.mxu3 %v302_v59 }
  0x38   :  { %332 = vmatpush.msra.mxu3 %v301_v60 }
  0x3a   :  { %333 = vmatpush.msra.mxu3 %v300_v61 }
  0x88   :  { %v166_v20 = vpop.permute.xlu0 %165 }
  0x89   :  { %v171_v22 = vmul.f32 %v386_v19, %v166_v20 }
  0x92   :  { %v131_v21 = vpop.f32.mrf.mxu0 }
  0x98   :  { %v159_v23 = vpop.f32.mrf.mxu1 }
  0x99   :  { %v160_v24 = vadd.f32 %v159_v23, %v131_v21 }
  0x9b   :  { %v172_v26 = vadd.f32 %v171_v22, %v160_v24 }
  0x9d   :  { %v175_v27 = vadd.f32 %v387_v25, %v172_v26 }
  0x9f   :  { %v176_v28 = vmax.f32 %v175_v27, 0.0 }
  0xa1   :  { %373 = vmatmul.msk.f32.vlgmr.msra.gmra.mxu2 %vm187_vm4, %v176_v28 }
 0x124   :  { %v208_v33 = vpop.f32.mrf.mxu2 }
 0x125   :  { %v209_v34 = vadd.f32 %v388_v32, %v208_v33 }
 0x127   :  { %v211_v35 = vmax.f32 %v209_v34, 0.0 }
 0x129   :  { %374 = vmatmul.msk.f32.vlgmr.msrb.gmra.mxu0 %vm218_vm5, %v211_v35 }
 0x1a6   :  { %v239_v39 = vpop.f32.mrf.mxu0 }
 0x1a7   :  { %v240_v40 = vadd.f32 %v389_v38, %v239_v39 }
 0x1a9   :  { %v242_v41 = vmax.f32 %v240_v40, 0.0 }
 0x1ab   :  { %375 = vmatmul.msk.f32.vlgmr.msra.gmra.mxu0 %vm247_vm6, %v242_v41 }
 0x228   :  { %v268_v56 = vpop.f32.mrf.mxu0 }
 0x229   :  { %v269_v57 = vadd.f32 %v390_v55, %v268_v56 }
 0x22b   :  { %v271_v58 = vmax.f32 %v269_v57, 0.0 }
 0x22d   :  { %376 = vmatmul.msk.f32.vlgmr.msrb.gmra.mxu1 %vm275_vm7, %v271_v58 }
 0x2aa   :  { %v296_v63 = vpop.f32.mrf.mxu1 }
 0x2ab   :  { %v297_v0 = vadd.f32 %v391_v62, %v296_v63 }
 0x2ad   :  { %v299_v1 = vmax.f32 %v297_v0, 0.0 }
 0x2af   :  { %334 = vmatmul.f32.vlgmr.msra.gmra.mxu3 %v299_v1 }
 0x332   :  { %v335_v3 = vpop.f32.mrf.mxu3 }
 0x333   :  { %v336_v4 = vadd.f32 %v392_v2, %v335_v3 }
 0x335   :  { %v377_v5 = vmul.f32 -1.442695, %v336_v4 }
 0x337   :  { %393 = vpow2.f32 %v377_v5 }
 0x33d   :  { %v394_v6 = vpop.eup %393 }
 0x33e   :  { %v341_v7 = vadd.f32 1.0, %v394_v6 }
 0x340   :  { %395 = vrcp.f32 %v341_v7  ;;  %v353_v12 = vand.u32 2147483648, %v341_v7  ;;  %v351_v15 = vand.u32 2147483647, %v341_v7  ;;  %vm347_vm9 = vweird.f32 %v341_v7 }
 0x342   :  { %v354_v17 = vor.u32 1.1754944e-38, %v353_v12  ;;  %vm352_vm12 = vcmp.eq.f32.partialorder %v351_v15, 8.507059e+37 }
 0x346   :  { %v396_v8 = vpop.eup %395 }
 0x347   :  { %v343_v10 = vmul.f32 %v396_v8, %v341_v7  ;;  %vm348_vm8 = vweird.f32 %v396_v8 }
 0x348   :  { %vm349_vm10 = vmor %vm347_vm9, %vm348_vm8 }
 0x349   :  { %v344_v11 = vsub.f32 1.0, %v343_v10 }
 0x34b   :  { %v345_v14 = vmul.f32 %v396_v8, %v344_v11 }
 0x34d   :  { %v346_v16 = vadd.f32 %v396_v8, %v345_v14 }
 0x34f   :  { %v350_v18 = vsel %vm349_vm10, %v396_v8, %v346_v16 }
 0x350   :  { %v355_v19 = vsel %vm352_vm12, %v354_v17, %v350_v18 }
 0x351   :  { %v360_v20 = vsel %vm359_vm11, %v297_v0, %v355_v19 }
 0x352   :  { %361 = vst [vmem:[%s700_s12] sm:$0xff] %v360_v20 }
 0x353   :  { %366 = vsyncpa [#allocation3], 1 }
 0x354   :  { %367 = vsyncpa [#allocation5], 1 }
 0x355   :  { %368 = vsyncpa [#allocation8], 1 }

</bundles_post_ra>
